<compile_context>
chip_gen: v7x
topology: tpu7x:2x2x1
jax: 0.10.0
libtpu: 0.0.40
codegen_flags: <defaults>
</compile_context>

<pallas_src>
import jax
import jax.numpy as jnp
from jax.experimental import pallas as pl
from jax.experimental.pallas import tpu as pltpu  # noqa: F401  (kept for optional CompilerParams)

block_size = 8
head_size = 8          # n_embd // num_heads
n_embd = 32
num_heads = 4


def _mha_kernel(x_ref, wqkv_ref, o_ref):
    """All heads in one invocation (no grid).

    x_ref    : (H, T, C)      per-head inputs
    wqkv_ref : (H, C, 3*hs)   fused [Wq | Wk | Wv] per head (x @ W layout)
    o_ref    : (1, T, H*hs)   heads concatenated along the last (lane) axis
    """
    H, T, C = x_ref.shape
    hs = wqkv_ref.shape[-1] // 3
    scale = hs ** (-0.5)

    if T > 1:
        # Causal mask built in-kernel (row >= col). Finite fill value avoids any
        # NaN risk from exp(-inf - (-inf)) on fully-masked rows.
        row = jax.lax.broadcasted_iota(jnp.int32, (T, T), 0)
        col = jax.lax.broadcasted_iota(jnp.int32, (T, T), 1)
        causal = row >= col
        neg_big = jnp.finfo(jnp.float32).min

    head_outs = []
    for h in range(H):                      # static unroll over the 4 heads
        x = x_ref[h]                        # (T, C) float32
        # Fused Q/K/V projection: one MXU matmul per head.
        qkv = jnp.dot(x, wqkv_ref[h], preferred_element_type=jnp.float32)  # (T, 3*hs)
        q = qkv[:, :hs]
        k = qkv[:, hs:2 * hs]
        v = qkv[:, 2 * hs:]

        if T > 1:
            s = jnp.dot(q, k.T, preferred_element_type=jnp.float32) * scale  # (T, T)
            s = jnp.where(causal, s, neg_big)
            m = jnp.max(s, axis=-1, keepdims=True)
            e = jnp.exp(s - m)
            inv_denom = pl.reciprocal(jnp.sum(e, axis=-1, keepdims=True), approx=True)
            p = e * inv_denom
            head_outs.append(jnp.dot(p, v, preferred_element_type=jnp.float32))
        else:
            # T == 1: the (unmasked diagonal) softmax is exactly 1 -> out = v.
            head_outs.append(v)

    # Single lane-dense store of the concatenated heads: (T, H*hs).
    o_ref[0] = jnp.concatenate(head_outs, axis=-1).astype(o_ref.dtype)


def multi_head_attention(x_heads, wq, wk, wv):
    """x_heads: (H, T, C); wq/wk/wv: (H, C, hs)  ->  (1, T, H*hs).

    Mirrors torch.cat([head(x) for head in heads], dim=-1). The module-level
    `x` argument is unused by the PyTorch forward and therefore not taken here.
    """
    H, T, C = x_heads.shape
    hs = wq.shape[-1]
    w_qkv = jnp.concatenate([wq, wk, wv], axis=-1)   # (H, C, 3*hs)
    return pl.pallas_call(
        _mha_kernel,
        out_shape=jax.ShapeDtypeStruct((1, T, H * hs), jnp.float32),
    )(x_heads, w_qkv)


def _reference(x_heads, wq, wk, wv):
    """Pure-JAX reference of the same math (for correctness asserts)."""
    q = jnp.einsum("htc,hcd->htd", x_heads, wq)
    k = jnp.einsum("htc,hcd->htd", x_heads, wk)
    v = jnp.einsum("htc,hcd->htd", x_heads, wv)
    s = jnp.einsum("htd,hsd->hts", q, k) * (k.shape[-1] ** (-0.5))
    T = x_heads.shape[1]
    causal = jnp.tril(jnp.ones((T, T), dtype=bool))
    s = jnp.where(causal[None], s, jnp.finfo(jnp.float32).min)
    p = jax.nn.softmax(s, axis=-1)
    o = jnp.einsum("hts,hsd->htd", p, v)
    H, T, hs = o.shape
    return jnp.transpose(o, (1, 0, 2)).reshape(1, T, H * hs)


if __name__ == "__main__":
    key = jax.random.PRNGKey(0)
    k_x, k_q, k_k, k_v, k_x8 = jax.random.split(key, 5)

    # Per-head "x" drawn inside each Head.forward (B=1, T=1, C=32).
    T = 1
    x_heads = jax.random.normal(k_x, (num_heads, T, n_embd), dtype=jnp.float32)

    # Deterministic nn.Linear(bias=False) weights, U(-1/sqrt(fan_in), 1/sqrt(fan_in)),
    # stored pre-transposed as (C, head_size) per head (x @ W layout).
    bound = 1.0 / (n_embd ** 0.5)
    wq = jax.random.uniform(k_q, (num_heads, n_embd, head_size), jnp.float32, -bound, bound)
    wk = jax.random.uniform(k_k, (num_heads, n_embd, head_size), jnp.float32, -bound, bound)
    wv = jax.random.uniform(k_v, (num_heads, n_embd, head_size), jnp.float32, -bound, bound)

    # Faithful shape (T = 1, as the PyTorch forward implies).
    out = jax.block_until_ready(multi_head_attention(x_heads, wq, wk, wv))
    expected = _reference(x_heads, wq, wk, wv)
    assert out.shape == (1, T, num_heads * head_size), out.shape
    assert jnp.allclose(out, expected, atol=1e-5, rtol=1e-5), "mismatch vs reference (T=1)"

    # Secondary check of the general masked-softmax path at T = block_size.
    # (Looser tolerance accounts for pl.reciprocal(approx=True).)
    x8 = jax.random.normal(k_x8, (num_heads, block_size, n_embd), dtype=jnp.float32)
    out8 = jax.block_until_ready(multi_head_attention(x8, wq, wk, wv))
    exp8 = _reference(x8, wq, wk, wv)
    assert out8.shape == (1, block_size, num_heads * head_size), out8.shape
    assert jnp.allclose(out8, exp8, atol=1e-2, rtol=1e-2), "mismatch vs reference (T=8)"

    print("KERNEL_OK")
</pallas_src>

<mosaic_0001>
module attributes {stable_mosaic.version = 11 : i64} {
  func.func @_mha_kernel(%arg0: memref<4x1x32xf32, #tpu.memory_space<vmem>>, %arg1: memref<4x32x24xf32, #tpu.memory_space<vmem>>, %arg2: memref<1x1x32xf32, #tpu.memory_space<vmem>>) attributes {dimension_semantics = [], scalar_prefetch = 0 : i64, scratch_operands = 0 : i64, tpu.core_type = #tpu.core_type<tc>} {
    %c0 = arith.constant 0 : index
    %c0_0 = arith.constant 0 : index
    %c0_1 = arith.constant 0 : index
    %0 = vector.load %arg0[%c0, %c0_0, %c0_1] : memref<4x1x32xf32, #tpu.memory_space<vmem>>, vector<1x1x32xf32>
    %1 = vector.shape_cast %0 : vector<1x1x32xf32> to vector<1x32xf32>
    %c0_2 = arith.constant 0 : index
    %c0_3 = arith.constant 0 : index
    %c0_4 = arith.constant 0 : index
    %2 = vector.load %arg1[%c0_2, %c0_3, %c0_4] : memref<4x32x24xf32, #tpu.memory_space<vmem>>, vector<1x32x24xf32>
    %3 = vector.shape_cast %2 : vector<1x32x24xf32> to vector<32x24xf32>
    %cst = arith.constant dense<0.000000e+00> : vector<1x24xf32>
    %4 = tpu.matmul %1, %3, %cst {dimension_numbers = #tpu.dot_dimension_numbers<[1], [0], [0], [1], [0, 0, 1, 1], [], []>} : vector<1x32xf32>, vector<32x24xf32>, vector<1x24xf32> -> vector<1x24xf32>
    %5 = vector.extract_strided_slice %4 {offsets = [0, 16], sizes = [1, 8], strides = [1, 1]} : vector<1x24xf32> to vector<1x8xf32>
    %c1 = arith.constant 1 : index
    %c0_5 = arith.constant 0 : index
    %c0_6 = arith.constant 0 : index
    %6 = vector.load %arg0[%c1, %c0_5, %c0_6] : memref<4x1x32xf32, #tpu.memory_space<vmem>>, vector<1x1x32xf32>
    %7 = vector.shape_cast %6 : vector<1x1x32xf32> to vector<1x32xf32>
    %c1_7 = arith.constant 1 : index
    %c0_8 = arith.constant 0 : index
    %c0_9 = arith.constant 0 : index
    %8 = vector.load %arg1[%c1_7, %c0_8, %c0_9] : memref<4x32x24xf32, #tpu.memory_space<vmem>>, vector<1x32x24xf32>
    %9 = vector.shape_cast %8 : vector<1x32x24xf32> to vector<32x24xf32>
    %cst_10 = arith.constant dense<0.000000e+00> : vector<1x24xf32>
    %10 = tpu.matmul %7, %9, %cst_10 {dimension_numbers = #tpu.dot_dimension_numbers<[1], [0], [0], [1], [0, 0, 1, 1], [], []>} : vector<1x32xf32>, vector<32x24xf32>, vector<1x24xf32> -> vector<1x24xf32>
    %11 = vector.extract_strided_slice %10 {offsets = [0, 16], sizes = [1, 8], strides = [1, 1]} : vector<1x24xf32> to vector<1x8xf32>
    %c2 = arith.constant 2 : index
    %c0_11 = arith.constant 0 : index
    %c0_12 = arith.constant 0 : index
    %12 = vector.load %arg0[%c2, %c0_11, %c0_12] : memref<4x1x32xf32, #tpu.memory_space<vmem>>, vector<1x1x32xf32>
    %13 = vector.shape_cast %12 : vector<1x1x32xf32> to vector<1x32xf32>
    %c2_13 = arith.constant 2 : index
    %c0_14 = arith.constant 0 : index
    %c0_15 = arith.constant 0 : index
    %14 = vector.load %arg1[%c2_13, %c0_14, %c0_15] : memref<4x32x24xf32, #tpu.memory_space<vmem>>, vector<1x32x24xf32>
    %15 = vector.shape_cast %14 : vector<1x32x24xf32> to vector<32x24xf32>
    %cst_16 = arith.constant dense<0.000000e+00> : vector<1x24xf32>
    %16 = tpu.matmul %13, %15, %cst_16 {dimension_numbers = #tpu.dot_dimension_numbers<[1], [0], [0], [1], [0, 0, 1, 1], [], []>} : vector<1x32xf32>, vector<32x24xf32>, vector<1x24xf32> -> vector<1x24xf32>
    %17 = vector.extract_strided_slice %16 {offsets = [0, 16], sizes = [1, 8], strides = [1, 1]} : vector<1x24xf32> to vector<1x8xf32>
    %c3 = arith.constant 3 : index
    %c0_17 = arith.constant 0 : index
    %c0_18 = arith.constant 0 : index
    %18 = vector.load %arg0[%c3, %c0_17, %c0_18] : memref<4x1x32xf32, #tpu.memory_space<vmem>>, vector<1x1x32xf32>
    %19 = vector.shape_cast %18 : vector<1x1x32xf32> to vector<1x32xf32>
    %c3_19 = arith.constant 3 : index
    %c0_20 = arith.constant 0 : index
    %c0_21 = arith.constant 0 : index
    %20 = vector.load %arg1[%c3_19, %c0_20, %c0_21] : memref<4x32x24xf32, #tpu.memory_space<vmem>>, vector<1x32x24xf32>
    %21 = vector.shape_cast %20 : vector<1x32x24xf32> to vector<32x24xf32>
    %cst_22 = arith.constant dense<0.000000e+00> : vector<1x24xf32>
    %22 = tpu.matmul %19, %21, %cst_22 {dimension_numbers = #tpu.dot_dimension_numbers<[1], [0], [0], [1], [0, 0, 1, 1], [], []>} : vector<1x32xf32>, vector<32x24xf32>, vector<1x24xf32> -> vector<1x24xf32>
    %23 = vector.extract_strided_slice %22 {offsets = [0, 16], sizes = [1, 8], strides = [1, 1]} : vector<1x24xf32> to vector<1x8xf32>
    %24 = tpu.concatenate %5, %11, %17, %23 in 1 : vector<1x8xf32>, vector<1x8xf32>, vector<1x8xf32>, vector<1x8xf32> -> vector<1x32xf32>
    %c0_23 = arith.constant 0 : index
    %c0_24 = arith.constant 0 : index
    %c0_25 = arith.constant 0 : index
    %25 = vector.load %arg2[%c0_23, %c0_24, %c0_25] : memref<1x1x32xf32, #tpu.memory_space<vmem>>, vector<1x1x32xf32>
    %26 = vector.shape_cast %25 : vector<1x1x32xf32> to vector<1x32xf32>
    %27 = vector.shape_cast %24 : vector<1x32xf32> to vector<1x1x32xf32>
    tpu.vector_store %arg2[%c0_23, %c0_24, %c0_25], %27 {strides = array<i32>} : memref<1x1x32xf32, #tpu.memory_space<vmem>>, vector<1x1x32xf32>,
    return
  }
}

</mosaic_0001>

<bundles_post_ra>
// kernel: tpu_custom_call.1
= control target key start
LH: loop header
LB: loop body
LE: loop exit
PB: predicated region body
PF: predicated region fallthrough
CT: control target
= control target key end

     0   :  { %v503_v3 = vmov 0.0|0.0   ;;  %vm504_vm0 = vmmov 0   ;;  %v505_v11 = vmov 0.0   ;;  %s605_s0 = inlined_call_operand.vmem [shape: f32[4,1,32], index: 0, kind: input, shape index: {}]   ;;  %s606_s1 = inlined_call_operand.vmem [shape: f32[4,32,24], index: 1, kind: input, shape index: {}]   ;;  %s607_s2 = inlined_call_operand.hbm [shape: f32[1,1,32], index: 2, kind: output, shape index: {}]  }
   0x1   :  { %v13_v0 = vld [vmem:[%s606_s1] sm:$0xff]  ;;  %v14_v1 = vld [vmem:[%s606_s1 + $0x8] sm:$0xff]  ;;  %448 = vmatprep.subr.bf16.mxu0 %v503_v3  ;;  %454 = vmatprep.subr.bf16.mxu1 %v503_v3  ;;  %v15_v6 = vld [vmem:[%s606_s1 + $0x10] sm:$0xff] }
   0x2   :  { %v367_v2 = vld [vmem:[%s606_s1 + $0x20] sm:$0xff]  ;;  %v449_v4 = vpack.c.bf16 %v14_v1, %v13_v0  ;;  %v368_v5 = vld [vmem:[%s606_s1 + $0x28] sm:$0xff]  ;;  %v16_v7 = vld [vmem:[%s606_s1 + $0x18] sm:$0xff]  ;;  %412 = vmatprep.mubr.msk.f32.mxu0 %vm504_vm0, %v505_v11  ;;  %423 = vmatprep.mubr.msk.f32.mxu1 %vm504_vm0, %v505_v11 }
   0x3   :  { %v455_v8 = vpack.c.bf16 %v368_v5, %v367_v2  ;;  %v369_v9 = vld [vmem:[%s606_s1 + $0x30] sm:$0xff]  ;;  %v370_v10 = vld [vmem:[%s606_s1 + $0x38] sm:$0xff]  ;;  %v452_v12 = vpack.c.bf16 %v16_v7, %v15_v6  ;;  %v379_v14 = vld [vmem:[%s606_s1 + $0x60] sm:$0xff] }
   0x4   :  { %450 = vmatpush3.bf16.msra.mxu0 %v449_v4  ;;  %v458_v13 = vpack.c.bf16 %v370_v10, %v369_v9  ;;  %v380_v15 = vld [vmem:[%s606_s1 + $0x68] sm:$0xff]  ;;  %v373_v16 = vld [vmem:[%s606_s1 + $0x40] sm:$0xff] }
   0x5   :  { %456 = vmatpush3.bf16.msra.mxu1 %v455_v8  ;;  %451 = vmatprep.subr.bf16.mxu0 %v503_v3  ;;  %v374_v17 = vld [vmem:[%s606_s1 + $0x48] sm:$0xff] }
   0x6   :  { %457 = vmatprep.subr.bf16.mxu1 %v503_v3 }
   0x7   :  { %7 = vsyncpa [#allocation3], 0  ;;  %v12_v18 = vld [vmem:[%s605_s0] sm:$0x1]  ;;  %vm17_vm1 = vcmask 261120   ;;  %v461_v19 = vpack.c.bf16 %v374_v17, %v373_v16  ;;  %v467_v21 = vpack.c.bf16 %v380_v15, %v379_v14  ;;  %v375_v22 = vld [vmem:[%s606_s1 + $0x50] sm:$0xff] }
   0x8   :  { %453 = vmatpush3.bf16.msra.mxu0 %v452_v12  ;;  %v366_v20 = vld [vmem:[%s605_s0 + $0x1] sm:$0x1]  ;;  %v376_v23 = vld [vmem:[%s606_s1 + $0x58] sm:$0xff]  ;;  %v381_v24 = vld [vmem:[%s606_s1 + $0x70] sm:$0xff]  ;;  %s506_s20 = smov 112   ;;  %s507_s21 = smov 120  }
   0x9   :  { %459 = vmatpush3.bf16.msra.mxu1 %v458_v13  ;;  %460 = vmatprep.subr.bf16.mxu0 %v503_v3  ;;  %v382_v25 = vld [vmem:[%s606_s1 + $0x78] sm:$0xff]  ;;  %v464_v26 = vpack.c.bf16 %v376_v23, %v375_v22  ;;  %v372_v28 = vld [vmem:[%s605_s0 + $0x2] sm:$0x1]  ;;  %v378_v29 = vld [vmem:[%s605_s0 + $0x3] sm:$0x1]  ;;  %s508_s22 = smov 8  }
   0xa   :  { %466 = vmatprep.subr.bf16.mxu1 %v503_v3  ;;  %v470_v27 = vpack.c.bf16 %v382_v25, %v381_v24  ;;  %vm343_vm2 = vcmask 64512   ;;  %vm345_vm3 = vcmask 130048   ;;  %s509_s0 = smov [#allocation2]   ;;  %vm347_vm4 = vcmask 195584  }
   0xb   :  { %413 = vmatmul.mubr.msk.f32.vlgmr.msra.gmra.mrb[0].mxu0 %vm17_vm1, %v12_v18  ;;  %s357_s23 = sshll.u32 %s509_s0, 4  ;;  %vm349_vm5 = vcmask 253952   ;;  %s358_s23 = int_to_ptr.vmem [resolvable:$true] %s357_s23 }
   0xc   :  { %424 = vmatmul.mubr.msk.f32.vlgmr.msra.gmra.mrb[0].mxu1 %vm17_vm1, %v366_v20  ;;  %462 = vmatpush3.bf16.msra.mxu0 %v461_v19  ;;  %s479_s24 = scalar_lea.vmem %s358_s23, 16  ;;  %s483_s25 = scalar_lea.vmem %s358_s23, 32 }
   0xd   :  { %468 = vmatpush3.bf16.msra.mxu1 %v467_v21  ;;  %445 = vmatprep.mubr.msk.f32.mxu1 %vm504_vm0, %v505_v11  ;;  %p480_p0 = scmp.ne.s32.totalorder %s358_s23, %s479_s24  ;;  %p484_p1 = scmp.lt.s32.totalorder %s358_s23, %s358_s23 }
   0xe   :  { %469 = vmatprep.subr.bf16.mxu1 %v503_v3  ;;  %463 = vmatprep.subr.bf16.mxu0 %v503_v3  ;;  %p485_p2 = scmp.lt.s32.totalorder %s483_s25, %s479_s24 }
   0xf   :  { %434 = vmatprep.mubr.msk.f32.mxu0 %vm504_vm0, %v505_v11 }
  0x10   :  { %465 = vmatpush3.bf16.msra.mxu0 %v464_v26  ;;  %p486_p3 = por %p485_p2, %p484_p1 }
  0x11   :  { %471 = vmatpush3.bf16.msra.mxu1 %v470_v27 }
  0x12   :  { %p487_p4 = pnand %p486_p3, %p480_p0 }
  0x13   :  { %435 = vmatmul.mubr.msk.f32.vlgmr.msra.gmra.mrb[2].mxu0 %vm17_vm1, %v372_v28 }
  0x14   :  { %446 = vmatmul.mubr.msk.f32.vlgmr.msra.gmra.mrb[2].mxu1 %vm17_vm1, %v378_v29 }
  0xde   :  { %v87_v30 = vpop.f32.mrb[0].mxu0 }
  0xdf   :  { %v167_v31 = vpop.f32.mrb[0].mxu1  ;;  %332 = vrot.lane.b32.xlu0 %v87_v30, %s506_s20  ;;  %v414_v32 = vpop.f32.mrb[1].mxu0 }
  0xe0   :  { %v425_v33 = vpop.f32.mrb[1].mxu1 }
  0xe3   :  { %336 = vrot.lane.b32.xlu0 %v167_v31, %s507_s21 }
  0xe6   :  { %v247_v34 = vpop.f32.mrb[2].mxu0 }
  0xe7   :  { %v327_v35 = vpop.f32.mrb[2].mxu1  ;;  %v436_v36 = vpop.f32.mrb[3].mxu0 }
  0xe8   :  { %340 = vrot.lane.b32.xlu1 %v327_v35, %s508_s22  ;;  %v447_v37 = vpop.f32.mrb[3].mxu1 }
 0x151   :  { %v333_v38 = vpop.permute.xlu0 %332 }
 0x155   :  { %v337_v39 = vpop.permute.xlu0 %336 }
 0x156   :  { %v344_v40 = vsel %vm343_vm2, %v333_v38, %v337_v39 }
 0x157   :  { %v346_v41 = vsel %vm345_vm3, %v344_v40, %v247_v34 }
 0x15a   :  { %v341_v42 = vpop.permute.xlu1 %340 }
 0x15b   :  { %v348_v43 = vsel %vm347_vm4, %v346_v41, %v341_v42 }
 0x15c   :  { %350 = vst.msk [vmem:[#allocation2] sm:$0x1] %vm349_vm5, %v348_v43 }
 0x15d   :  { %490 = shalt.err (!%p487_p4)
}
 0x15e   :  { %s491_s28 = scalar_lea.hbm %s607_s2, 16 }
 0x15f   :  { %p492_p5 = scmp.ne.s32.totalorder %s607_s2, %s491_s28  ;;  %p495_p6 = scmp.lt.u32.totalorder %s491_s28, %s607_s2 }
 0x161   :  { %p497_p7 = pnand %p495_p6, %p492_p5 }
 0x163   :  { %500 = shalt.err (!%p497_p7)
}
 0x164   :  { %360 = dma.vmem_to_hbm [thread:$0]  %s358_s23, 16, %s607_s2, [#allocation3]  }
 0x165   :  { %501 = dma.done.wait [#allocation3], 16  }
 0x166   :  { %502 = vsyncadd [#allocation3], 4294967280 }
 0x167   :  { %364 = vsyncpa [#allocation3], 1 }

</bundles_post_ra>
